<compile_context>
chip_gen: v7x
topology: tpu7x:2x2x1
jax: 0.10.0
libtpu: 0.0.40
codegen_flags: <defaults>
</compile_context>

<pallas_src>
import functools

import jax
import jax.numpy as jnp
from jax.experimental import pallas as pl
from jax.experimental.pallas import tpu as pltpu

BETA = 0.99          # snn.Leaky(beta=0.99); cancels on the first step (mem0 = 0)
THRESHOLD = 1.0      # snntorch default threshold
# TODO(synk): surrogate.atan() only defines the backward surrogate gradient;
# the forward pass is an exact heaviside, so nothing is lost here.


def _repeat_store_kernel(spk_ref, o_ref, *, t_chunk: int, lc: int):
    # spk_ref: (tb, L*C) int8 spikes, already in (l, c) element order.
    # o_ref:   (tb, t_chunk * L*C) lane-dense output tile (sublane dim = tb).
    spk = spk_ref[...].astype(o_ref.dtype)           # single small int8 -> out cast
    for t in range(t_chunk):                         # re-store the same vregs T times
        o_ref[:, t * lc:(t + 1) * lc] = spk


def _round_up(x: int, m: int) -> int:
    return -(-x // m) * m


def _plan_tiles(batch: int, lc: int, t_total: int, in_item: int, out_item: int,
                budget_bytes: int = 8 * 1024 * 1024):
    """Pick (tb, t_chunk): batch rows and repeats per grid block.

    One (input + output) block is kept under `budget_bytes` so the double-
    buffered working set stays well inside the 32 MiB scoped-VMEM default on
    v5e/v6e/v7x.  tb is a multiple of the out-dtype sublane pack (8/16/32 for
    f32/bf16/int8) or equal to the full batch, so output stores stay dense.
    The T axis is split into the grid only when even one sublane-pack of rows
    would not fit (huge out_size*L*C on v7x's 64 MiB VMEM)."""
    sublane = max(8, 32 // max(1, out_item))         # 8 (f32) / 16 (bf16) / 32 (int8)
    row_in = lc * in_item

    # 1) Repeats per block. Only split when L*C is 128-aligned so the split
    #    output blocks remain lane-tile aligned.
    t_chunk = t_total
    while (t_chunk > 1 and lc % 128 == 0
           and sublane * (row_in + t_chunk * lc * out_item) > budget_bytes):
        t_chunk = next(d for d in range(t_chunk - 1, 0, -1) if t_total % d == 0)

    row_bytes = row_in + t_chunk * lc * out_item
    fit = max(1, budget_bytes // row_bytes)          # rows per block the budget allows

    # 2) Batch rows per block.
    if fit >= batch:
        # Whole batch fits the budget; still aim for a few blocks so writeback
        # DMAs pipeline and both v7x TensorCores get work (harmless on v5e/v6e).
        blocks = min(4, max(1, batch // sublane))
        if blocks <= 1:
            tb = batch
        else:
            tb = min(batch, _round_up(-(-batch // blocks), sublane))
    elif fit >= sublane:
        tb = (fit // sublane) * sublane              # sublane-aligned -> dense stores
    else:
        tb = min(sublane, batch)                     # extreme row size: exceed budget;
                                                     # vmem_limit_bytes is raised to match
    return tb, t_chunk


@functools.partial(jax.jit, static_argnums=(1, 2))
def repeat_encoder(x: jax.Array, out_size: int, out_dtype=None) -> jax.Array:
    """x: (B, C, L) float -> spikes (B, out_size, L, C).

    out_dtype defaults to x.dtype (PyTorch-identical float spikes).  Spikes are
    exactly 0/1, so jnp.bfloat16 / jnp.int8 output is lossless and halves /
    quarters the dominant HBM writeback of this store-bound op — use it
    whenever the downstream consumer allows.
    """
    B, C, L = x.shape
    LC = L * C
    T = int(out_size)
    out_dtype = jnp.dtype(x.dtype if out_dtype is None else out_dtype)
    in_dtype = jnp.dtype(jnp.int8)          # 0/1 spikes: lossless 1-byte carrier

    # Threshold compare + (C, L)->(L, C) relayout in one fused XLA pass over the
    # (out_size-times smaller) input; the intermediate is int8, not raw f32.
    spk_in = (jnp.swapaxes(x, 1, 2) > THRESHOLD).astype(in_dtype).reshape(B, LC)

    tb, t_chunk = _plan_tiles(B, LC, T, in_dtype.itemsize, out_dtype.itemsize)

    in_blk = tb * LC * in_dtype.itemsize
    out_blk = tb * t_chunk * LC * out_dtype.itemsize
    vmem_limit = int(min(48 << 20, max(32 << 20, 2 * (in_blk + out_blk) + (4 << 20))))

    kernel = functools.partial(_repeat_store_kernel, t_chunk=t_chunk, lc=LC)
    y = pl.pallas_call(
        kernel,
        out_shape=jax.ShapeDtypeStruct((B, T * LC), out_dtype),
        grid=(pl.cdiv(B, tb), T // t_chunk),
        in_specs=[pl.BlockSpec((tb, LC), lambda i, j: (i, 0))],
        out_specs=pl.BlockSpec((tb, t_chunk * LC), lambda i, j: (i, j)),
        compiler_params=pltpu.CompilerParams(
            dimension_semantics=("parallel", "parallel"),
            vmem_limit_bytes=vmem_limit,
        ),
    )(spk_in)

    # Free row-major reshape back to the PyTorch output layout (B, T, L, C).
    return y.reshape(B, T, L, C)


if __name__ == "__main__":
    key = jax.random.PRNGKey(0)
    B, C, L = 2, 8, 128       # batch, channels, sequence length
    out_size = 4              # number of repeat time steps

    # Scale so a good fraction of values exceed the firing threshold of 1.0.
    x = 1.5 * jax.random.normal(key, (B, C, L), dtype=jnp.float32)

    y = repeat_encoder(x, out_size)
    y = jax.block_until_ready(y)

    # Pure-JAX reference of the PyTorch forward pass.
    ref = jnp.broadcast_to(x[None], (out_size, B, C, L))      # repeat
    ref = jnp.transpose(ref, (1, 0, 3, 2))                    # permute(1, 0, 3, 2)
    ref = (ref > THRESHOLD).astype(jnp.float32)               # single Leaky step

    assert y.shape == (B, out_size, L, C), y.shape
    assert y.dtype == jnp.float32, y.dtype
    assert jnp.array_equal(y, ref), "mismatch vs reference"

    print("KERNEL_OK")
</pallas_src>

<mosaic_0001>
module attributes {stable_mosaic.version = 11 : i64} {
  func.func @_repeat_store_kernel(%arg0: i32, %arg1: i32, %arg2: memref<2x1024xi8, #tpu.memory_space<vmem>>, %arg3: memref<2x4096xf32, #tpu.memory_space<vmem>>) attributes {dimension_semantics = [#tpu.dimension_semantics<parallel>, #tpu.dimension_semantics<parallel>], iteration_bounds = array<i64: 1, 1>, scalar_prefetch = 0 : i64, scratch_operands = 0 : i64, tpu.core_type = #tpu.core_type<tc>, window_params = [{transform_indices = @transform_0, window_bounds = array<i64: 2, 1024>}, {transform_indices = @transform_1, window_bounds = array<i64: 2, 4096>}]} {
    %c0 = arith.constant 0 : index
    %c0_0 = arith.constant 0 : index
    %0 = vector.load %arg2[%c0, %c0_0] : memref<2x1024xi8, #tpu.memory_space<vmem>>, vector<2x1024xi8>
    %1 = arith.sitofp %0 : vector<2x1024xi8> to vector<2x1024xf32>
    %c0_1 = arith.constant 0 : index
    %c0_2 = arith.constant 0 : index
    %2 = vector.load %arg3[%c0_1, %c0_2] : memref<2x4096xf32, #tpu.memory_space<vmem>>, vector<2x1024xf32>
    tpu.vector_store %arg3[%c0_1, %c0_2], %1 {strides = array<i32>} : memref<2x4096xf32, #tpu.memory_space<vmem>>, vector<2x1024xf32>,
    %c0_3 = arith.constant 0 : index
    %c1024 = arith.constant 1024 : index
    %3 = vector.load %arg3[%c0_3, %c1024] : memref<2x4096xf32, #tpu.memory_space<vmem>>, vector<2x1024xf32>
    tpu.vector_store %arg3[%c0_3, %c1024], %1 {strides = array<i32>} : memref<2x4096xf32, #tpu.memory_space<vmem>>, vector<2x1024xf32>,
    %c0_4 = arith.constant 0 : index
    %c2048 = arith.constant 2048 : index
    %4 = vector.load %arg3[%c0_4, %c2048] : memref<2x4096xf32, #tpu.memory_space<vmem>>, vector<2x1024xf32>
    tpu.vector_store %arg3[%c0_4, %c2048], %1 {strides = array<i32>} : memref<2x4096xf32, #tpu.memory_space<vmem>>, vector<2x1024xf32>,
    %c0_5 = arith.constant 0 : index
    %c3072 = arith.constant 3072 : index
    %5 = vector.load %arg3[%c0_5, %c3072] : memref<2x4096xf32, #tpu.memory_space<vmem>>, vector<2x1024xf32>
    tpu.vector_store %arg3[%c0_5, %c3072], %1 {strides = array<i32>} : memref<2x4096xf32, #tpu.memory_space<vmem>>, vector<2x1024xf32>,
    return
  }
  func.func @transform_0(%arg0: i32, %arg1: i32) -> (i32, i32) {
    %c0_i32 = arith.constant 0 : i32
    %c0_i32_0 = arith.constant 0 : i32
    return %arg0, %c0_i32 : i32, i32
  }
  func.func @transform_1(%arg0: i32, %arg1: i32) -> (i32, i32) {
    %c0_i32 = arith.constant 0 : i32
    return %arg0, %arg1 : i32, i32
  }
}

</mosaic_0001>

<bundles_post_ra>
// kernel: repeat_encoder.1
= control target key start
LH: loop header
LB: loop body
LE: loop exit
PB: predicated region body
PF: predicated region fallthrough
CT: control target
= control target key end

     0   :  { %v24_v0 = vlaneseq  ;;  %v66_v2 = vmov 1983009808   ;;  %s104_s0 = inlined_call_operand.vmem [shape: s8[2,1024], index: 0, kind: input, shape index: {}]   ;;  %s105_s1 = inlined_call_operand.vmem [shape: f32[2,4096], index: 1, kind: output, shape index: {}]  }
   0x1   :  { %v8_v1 = vld [vmem:[%s104_s0] sm:$0xff]  ;;  %v22_v3 = vunpack.c.l.s4 %v66_v2 }
   0x2   :  { %v9_v4 = vunpack.c.0.s8 %v8_v1  ;;  %v10_v5 = vunpack.c.1.s8 %v8_v1  ;;  %v25_v6 = vshrl.u32 %v24_v0, 7  ;;  %v11_v7 = vunpack.c.2.s8 %v8_v1 }
   0x3   :  { %v23_v8 = vunpack.c.0.s8 %v22_v3  ;;  %v12_v9 = vunpack.c.3.s8 %v8_v1 }
   0x4   :  { %v13_v10 = vcvt.s32.f32 %v9_v4  ;;  %v14_v11 = vcvt.s32.f32 %v10_v5  ;;  %v15_v12 = vcvt.s32.f32 %v11_v7 }
   0x5   :  { %v26_v13 = vsub.s32 %v23_v8, %v25_v6  ;;  %v16_v14 = vcvt.s32.f32 %v12_v9 }
   0x7   :  { %v27_v15 = vrot.slane %v13_v10, %v26_v13  ;;  %v34_v16 = vrot.slane %v14_v11, %v26_v13  ;;  %v42_v17 = vrot.slane %v15_v12, %v26_v13  ;;  %v49_v18 = vrot.slane %v16_v14, %v26_v13 }
   0x9   :  { %v35_v19 = vcombine.low %v27_v15, %v34_v16  ;;  %v50_v20 = vcombine.low %v42_v17, %v49_v18 }
   0xb   :  { %53 = vst [vmem:[%s105_s1] sm:$0xff] %v35_v19  ;;  %55 = vst [vmem:[%s105_s1 + $0x10] sm:$0xff] %v35_v19 }
   0xc   :  { %57 = vst [vmem:[%s105_s1 + $0x20] sm:$0xff] %v35_v19  ;;  %59 = vst [vmem:[%s105_s1 + $0x30] sm:$0xff] %v35_v19 }
   0xd   :  { %54 = vst [vmem:[%s105_s1 + $0x8] sm:$0xff] %v50_v20  ;;  %56 = vst [vmem:[%s105_s1 + $0x18] sm:$0xff] %v50_v20 }
   0xe   :  { %58 = vst [vmem:[%s105_s1 + $0x28] sm:$0xff] %v50_v20  ;;  %60 = vst [vmem:[%s105_s1 + $0x38] sm:$0xff] %v50_v20 }

</bundles_post_ra>
